<compile_context>
chip_gen: v7x
topology: tpu7x:2x2x1
jax: 0.10.0
libtpu: 0.0.40
codegen_flags: <defaults>
</compile_context>

<pallas_src>
import math

import jax
import jax.numpy as jnp
from jax import lax
from jax.experimental import pallas as pl
from jax.experimental.pallas import tpu as pltpu


# ----------------------------------------------------------------------------
# Kernel 1: dense per-relation projection.
#   out[r] = feat2d @ W_all[r] + h_bias * (r < num_rels)
# Grid iterates over r in 0..R (row R is the self-loop weight, no bias).
# ----------------------------------------------------------------------------
def _proj_kernel(feat_ref, w_ref, b_ref, out_ref):
    r = pl.program_id(0)
    num_rels = pl.num_programs(0) - 1                     # last step = self-loop weight
    y = jnp.dot(feat_ref[...], w_ref[0], preferred_element_type=jnp.float32)
    bias_scale = jnp.where(r < num_rels, 1.0, 0.0).astype(jnp.float32)
    out_ref[0] = y + b_ref[...] * bias_scale


def _project_all(feat2d, w_all, bias2d):
    NB, I = feat2d.shape
    Rp1, _, O = w_all.shape
    return pl.pallas_call(
        _proj_kernel,
        out_shape=jax.ShapeDtypeStruct((Rp1, NB, O), jnp.float32),
        grid_spec=pl.GridSpec(
            grid=(Rp1,),
            in_specs=[
                pl.BlockSpec((NB, I), lambda r: (0, 0)),       # feat, resident
                pl.BlockSpec((1, I, O), lambda r: (r, 0, 0)),  # weight[r]
                pl.BlockSpec((1, O), lambda r: (0, 0)),        # h_bias, resident
            ],
            out_specs=pl.BlockSpec((1, NB, O), lambda r: (r, 0, 0)),
        ),
        compiler_params=pltpu.CompilerParams(
            dimension_semantics=("parallel",)),
    )(feat2d, w_all, bias2d)


# ----------------------------------------------------------------------------
# Kernel 2: edge aggregation.  TILE_E edges per grid step; all tables in SMEM,
# projected messages and the output accumulator resident in VMEM.
# ----------------------------------------------------------------------------
def _make_edge_kernel(tile_e):
    def _edge_kernel(
        etype_ref,   # SMEM (Ep,) int32   scalar prefetch
        src_ref,     # SMEM (Ep,) int32   scalar prefetch
        dst_ref,     # SMEM (Ep,) int32   scalar prefetch
        att_ref,     # SMEM (Ep,) f32     memory_space=SMEM input
        proj_ref,    # VMEM ((R+1)*N, B, O) resident, proj[r*N + n] = feat[n] @ W_r (+bias)
        out_ref,     # VMEM (N, B, O)     resident accumulator
    ):
        step = pl.program_id(0)
        n_nodes = out_ref.shape[0]

        @pl.when(step == 0)
        def _():
            out_ref[...] = jnp.zeros_like(out_ref)

        base = step * tile_e

        def body(i, carry):
            e = base + i
            s = src_ref[e]
            d = dst_ref[e]
            et = etype_ref[e]
            a = att_ref[e]
            msg = proj_ref[et * n_nodes + s]          # (B, O) in-VMEM gather
            out_ref[d] = out_ref[d] + a * msg         # sequential scatter-add
            return carry

        lax.fori_loop(0, tile_e, body, 0, unroll=True)

    return _edge_kernel


def fam_relgraphconv(feat, weight, h_bias, loop_weight, src, dst, etype, attention,
                     *, tile_e=16):
    """feat: (N,B,I) f32; weight: (R,I,O); h_bias: (O,); loop_weight: (I,O);
    src/dst/etype: (E,) int32; attention: (E,1,1) f32 -> (N,B,O) f32."""
    N, B, I = feat.shape
    R, _, O = weight.shape
    E = src.shape[0]

    # ---- dense projections: one full-width matmul per relation (+ self-loop) ----
    w_all = jnp.concatenate([weight, loop_weight[None]], axis=0).astype(jnp.float32)
    feat2d = feat.reshape(N * B, I).astype(jnp.float32)
    bias2d = h_bias.reshape(1, O).astype(jnp.float32)
    proj_all = _project_all(feat2d, w_all, bias2d)            # (R+1, N*B, O)
    proj_flat = proj_all.reshape((R + 1) * N, B, O)           # row r*N + n

    # ---- edge list: real edges ++ self-loop edges (rel R, att 1) ++ padding (att 0) ----
    node_ids = jnp.arange(N, dtype=jnp.int32)
    etype_all = jnp.concatenate([etype.astype(jnp.int32),
                                 jnp.full((N,), R, jnp.int32)])
    src_all = jnp.concatenate([src.astype(jnp.int32), node_ids])
    dst_all = jnp.concatenate([dst.astype(jnp.int32), node_ids])
    att_all = jnp.concatenate([attention.reshape(-1).astype(jnp.float32),
                               jnp.ones((N,), jnp.float32)])

    e_tot = E + N
    n_steps = max(1, pl.cdiv(e_tot, tile_e))
    e_pad = n_steps * tile_e - e_tot
    if e_pad:
        etype_all = jnp.concatenate([etype_all, jnp.zeros((e_pad,), jnp.int32)])
        src_all = jnp.concatenate([src_all, jnp.zeros((e_pad,), jnp.int32)])
        dst_all = jnp.concatenate([dst_all, jnp.zeros((e_pad,), jnp.int32)])
        att_all = jnp.concatenate([att_all, jnp.zeros((e_pad,), jnp.float32)])

    grid_spec = pltpu.PrefetchScalarGridSpec(
        num_scalar_prefetch=3,
        grid=(n_steps,),
        in_specs=[
            # per-edge attention: whole array in SMEM (scalar multiplies only)
            pl.BlockSpec(memory_space=pltpu.MemorySpace.SMEM),
            # all projected messages resident in VMEM (no per-edge DMA)
            pl.BlockSpec(((R + 1) * N, B, O), lambda e, et, s, d: (0, 0, 0)),
        ],
        out_specs=pl.BlockSpec((N, B, O), lambda e, et, s, d: (0, 0, 0)),
    )

    return pl.pallas_call(
        _make_edge_kernel(tile_e),
        out_shape=jax.ShapeDtypeStruct((N, B, O), jnp.float32),
        grid_spec=grid_spec,
        compiler_params=pltpu.CompilerParams(
            dimension_semantics=("arbitrary",)),   # serial edge axis: scatter-add RMW
    )(etype_all, src_all, dst_all, att_all, proj_flat)


def _reference(feat, weight, h_bias, loop_weight, src, dst, etype, attention):
    n = feat.shape[0]
    w_e = weight[etype]                                   # (E, I, O)
    h_src = feat[src]                                     # (E, B, I)
    m = (jnp.einsum("ebi,eio->ebo", h_src, w_e) + h_bias) * attention
    agg = jax.ops.segment_sum(m, dst, num_segments=n)     # sum over incoming edges
    return agg + jnp.einsum("nbi,io->nbo", feat, loop_weight)


if __name__ == "__main__":
    # Small, deterministic synthetic graph & parameters.
    N = 8        # number of nodes (num_dst_nodes == N)
    E = 16       # number of edges
    R = 3        # num_rels
    B = 2        # per-node feature rows (bmm "batch" dim in the message fn)
    I = 16       # in_feat
    O = 32       # out_feat

    key = jax.random.PRNGKey(0)
    k_w, k_lw, k_b, k_f, k_s, k_d, k_e, k_a = jax.random.split(key, 8)

    gain = math.sqrt(2.0)  # calculate_gain('relu')
    bw = gain * math.sqrt(6.0 / (I * O + R * O))
    weight = jax.random.uniform(k_w, (R, I, O), jnp.float32, -bw, bw)
    bl = gain * math.sqrt(6.0 / (I + O))
    loop_weight = jax.random.uniform(k_lw, (I, O), jnp.float32, -bl, bl)
    # Module initializes h_bias to zeros; use a nonzero value here to exercise the
    # (bmm + bias) * attention path of the forward semantics.
    h_bias = 0.1 * jax.random.normal(k_b, (O,), jnp.float32)

    feat = jax.random.normal(k_f, (N, B, I), jnp.float32)
    src = jax.random.randint(k_s, (E,), 0, N, jnp.int32)
    dst = jax.random.randint(k_d, (E,), 0, N, jnp.int32)
    etype = jax.random.randint(k_e, (E,), 0, R, jnp.int32)
    attention = jax.random.uniform(k_a, (E, 1, 1), jnp.float32)

    out = fam_relgraphconv(feat, weight, h_bias, loop_weight,
                           src, dst, etype, attention)
    out = jax.block_until_ready(out)

    ref = _reference(feat, weight, h_bias, loop_weight,
                     src, dst, etype, attention)
    assert out.shape == (N, B, O)
    assert jnp.allclose(out, ref, atol=1e-4, rtol=1e-4), (
        f"max abs err {jnp.max(jnp.abs(out - ref))}")
    print("KERNEL_OK")
</pallas_src>

<mosaic_0001>
module attributes {stable_mosaic.version = 11 : i64} {
  func.func @_proj_kernel(%arg0: i32, %arg1: memref<16x16xf32, #tpu.memory_space<vmem>>, %arg2: memref<1x16x32xf32, #tpu.memory_space<vmem>>, %arg3: memref<1x32xf32, #tpu.memory_space<vmem>>, %arg4: memref<1x16x32xf32, #tpu.memory_space<vmem>>) attributes {dimension_semantics = [#tpu.dimension_semantics<parallel>], iteration_bounds = array<i64: 4>, scalar_prefetch = 0 : i64, scratch_operands = 0 : i64, tpu.core_type = #tpu.core_type<tc>, window_params = [{pipeline_mode = #tpu.pipeline_mode<synchronous>, transform_indices = @transform_0, window_bounds = array<i64: 16, 16>}, {transform_indices = @transform_1, window_bounds = array<i64: 1, 16, 32>}, {pipeline_mode = #tpu.pipeline_mode<synchronous>, transform_indices = @transform_2, window_bounds = array<i64: 1, 32>}, {transform_indices = @transform_3, window_bounds = array<i64: 1, 16, 32>}]} {
    %c0 = arith.constant 0 : index
    %c0_0 = arith.constant 0 : index
    %0 = vector.load %arg1[%c0, %c0_0] : memref<16x16xf32, #tpu.memory_space<vmem>>, vector<16x16xf32>
    %c0_1 = arith.constant 0 : index
    %c0_2 = arith.constant 0 : index
    %c0_3 = arith.constant 0 : index
    %1 = vector.load %arg2[%c0_1, %c0_2, %c0_3] : memref<1x16x32xf32, #tpu.memory_space<vmem>>, vector<1x16x32xf32>
    %2 = vector.shape_cast %1 : vector<1x16x32xf32> to vector<16x32xf32>
    %cst = arith.constant dense<0.000000e+00> : vector<16x32xf32>
    %3 = tpu.matmul %0, %2, %cst {dimension_numbers = #tpu.dot_dimension_numbers<[1], [0], [0], [1], [0, 0, 1, 1], [], []>} : vector<16x16xf32>, vector<16x32xf32>, vector<16x32xf32> -> vector<16x32xf32>
    %c3_i32 = arith.constant 3 : i32
    %4 = arith.cmpi slt, %arg0, %c3_i32 : i32
    %cst_4 = arith.constant 1.000000e+00 : f32
    %cst_5 = arith.constant 0.000000e+00 : f32
    %5 = arith.select %4, %cst_4, %cst_5 : f32
    %c0_6 = arith.constant 0 : index
    %c0_7 = arith.constant 0 : index
    %6 = vector.load %arg3[%c0_6, %c0_7] : memref<1x32xf32, #tpu.memory_space<vmem>>, vector<1x32xf32>
    %7 = vector.broadcast %5 : f32 to vector<1x32xf32>
    %8 = arith.mulf %6, %7 : vector<1x32xf32>
    %9 = vector.broadcast %8 : vector<1x32xf32> to vector<16x32xf32>
    %10 = arith.addf %3, %9 : vector<16x32xf32>
    %c0_8 = arith.constant 0 : index
    %c0_9 = arith.constant 0 : index
    %c0_10 = arith.constant 0 : index
    %11 = vector.load %arg4[%c0_8, %c0_9, %c0_10] : memref<1x16x32xf32, #tpu.memory_space<vmem>>, vector<1x16x32xf32>
    %12 = vector.shape_cast %11 : vector<1x16x32xf32> to vector<16x32xf32>
    %13 = vector.shape_cast %10 : vector<16x32xf32> to vector<1x16x32xf32>
    tpu.vector_store %arg4[%c0_8, %c0_9, %c0_10], %13 {strides = array<i32>} : memref<1x16x32xf32, #tpu.memory_space<vmem>>, vector<1x16x32xf32>,
    return
  }
  func.func @transform_0(%arg0: i32) -> (i32, i32) {
    %c0_i32 = arith.constant 0 : i32
    %c0_i32_0 = arith.constant 0 : i32
    %c0_i32_1 = arith.constant 0 : i32
    return %c0_i32, %c0_i32_0 : i32, i32
  }
  func.func @transform_1(%arg0: i32) -> (i32, i32, i32) {
    %c0_i32 = arith.constant 0 : i32
    %c0_i32_0 = arith.constant 0 : i32
    %c0_i32_1 = arith.constant 0 : i32
    return %arg0, %c0_i32, %c0_i32_0 : i32, i32, i32
  }
  func.func @transform_2(%arg0: i32) -> (i32, i32) {
    %c0_i32 = arith.constant 0 : i32
    %c0_i32_0 = arith.constant 0 : i32
    %c0_i32_1 = arith.constant 0 : i32
    return %c0_i32, %c0_i32_0 : i32, i32
  }
  func.func @transform_3(%arg0: i32) -> (i32, i32, i32) {
    %c0_i32 = arith.constant 0 : i32
    %c0_i32_0 = arith.constant 0 : i32
    %c0_i32_1 = arith.constant 0 : i32
    return %arg0, %c0_i32, %c0_i32_0 : i32, i32, i32
  }
}

</mosaic_0001>

<bundles_post_ra>
// kernel: tpu_custom_call.1
= control target key start
LH: loop header
LB: loop body
LE: loop exit
PB: predicated region body
PF: predicated region fallthrough
CT: control target
= control target key end

     0   :  { %8 = vsyncpa [#allocation3], 0  ;;  %s858_s0 = inlined_call_operand.hbm [shape: f32[16,16], index: 0, kind: input, shape index: {}]   ;;  %s859_s1 = inlined_call_operand.hbm [shape: f32[4,16,32], index: 1, kind: input, shape index: {}]   ;;  %s860_s2 = inlined_call_operand.vmem [shape: f32[1,32], index: 2, kind: input, shape index: {}]   ;;  %s861_s3 = inlined_call_operand.hbm [shape: f32[4,16,32], index: 3, kind: output, shape index: {}]  }
   0x1   :  { %9 = vsyncpa [#allocation6], 0 }
   0x2   :  { %11 = vsyncpa [#allocation6 + $0x1], 0 }
   0x3   :  { %12 = vsyncpa [#allocation4], 0 }
   0x4   :  { %14 = vsyncpa [#allocation4 + $0x1], 0  ;;  %s656_s12 = smov 0   ;;  %s658_s13 = smov 0  }
   0x5   :  { %s660_s14 = smov 0   ;;  %s662_s15 = smov 0  }
   0x6 LB: > { %s677_s16 = sadd.s32 4294967295, %s627_s15   ;;  %s403_s17 = sadd.s32 4294967294, %s627_s15   ;;  %s627_s15 = sphi %s662_s15, %s880_s15   ;;  %s623_s14 = sphi %s660_s14, %s879_s14   ;;  %s619_s13 = sphi %s658_s13, %s878_s13   ;;  %s615_s12 = sphi %s656_s12, %s877_s12  }
   0x7   : > { %p61_p0 = scmp.ne.s32.totalorder %s619_s13, %s615_s12  ;;  %p862_p1 = scmp.eq.s32.totalorder %s677_s16, 0 }
   0x8   : > { %p112_p3 = scmp.eq.s32.totalorder %s403_s17, 3  ;;  %p404_p5 = scmp.ge.s32.totalorder %s627_s15, 1 }
   0x9   : > { %p686_p4 = por %p862_p1, %p61_p0  ;;  %p119_p7 = scmp.lt.s32.totalorder %s627_s15, 5 }
   0xa   : > { %p691_p6 = por %p112_p3, %p61_p0  ;;  %s629_s21 = smov [#allocation2]  }
   0xb   : > { %s865_s18 = scalar_select %p686_p4, 1, 0 }
   0xc   : > { %s866_s19 = scalar_select %p691_p6, 1, 0 }
   0xd   : > { %p696_p8 = pnand %p404_p5, %p119_p7  ;;  %s131_s22 = sshll.u32 %s629_s21, 4  ;;  %s132_s22 = int_to_ptr.vmem [resolvable:$true] %s131_s22 }
   0xe   : > { %s709_s24 = sadd.s32 1, %s627_s15   ;;  %s48_s25 = sadd.s32 1, %s623_s14 }
   0xf   : > { %s867_s20 = scalar_select %p696_p8, 1, 0 }
  0x10   : > { %p446_p9 = pneg %p696_p8  ;;  %s45_s26 = ssub.s32 %s627_s15, %s709_s24 }
  0x11   : > { %s499_s29 = scalar_lea.hbm %s858_s0, 256 }
  0x12   : > { %p704_p10 = pnand %p446_p9, %p862_p1  ;;  %p500_p11 = scmp.ne.s32.totalorder %s858_s0, %s499_s29 }
  0x13   : > { %p506_p3 = scmp.lt.u32.totalorder %s499_s29, %s858_s0 }
  0x14   : > { %p501_p12 = pneg %p704_p10 }
  0x16   : > { %p502_p13 = pnand %p501_p12, %p500_p11 }
  0x18   : > { %p503_p0 = pneg %p502_p13 }
  0x1a   : > { %p508_p5 = pnand %p506_p3, %p503_p0 }
  0x1c   : > { %511 = shalt.err (!%p508_p5)
}
  0x1d   : > { %s512_s7 = scalar_lea.vmem %s132_s22, 256  ;;  %p520_p2 = scmp.lt.s32.totalorder %s132_s22, %s132_s22 }
  0x1e   : > { %p513_p7 = scmp.ne.s32.totalorder %s132_s22, %s512_s7  ;;  %p521_p6 = scmp.lt.s32.totalorder %s512_s7, %s512_s7 }
  0x20   : > { %p515_p9 = pnand %p513_p7, %p501_p12  ;;  %p522_p4 = por %p521_p6, %p520_p2 }
  0x22   : > { %p516_p1 = pneg %p515_p9 }
  0x24   : > { %p523_p8 = pnand %p522_p4, %p516_p1 }
  0x26   : > { %526 = shalt.err (!%p523_p8)
}
  0x27   : > { %s630_s8 = smov 128   ;;  %s631_s9 = smov 8  }
  0x28   : > { %449 = dma.hbm_to_vmem [thread:$0]  (!%p704_p10), %s858_s0, 256, %s132_s22, [#allocation3], %s630_s8, %s630_s8, %s631_s9  }
  0x29   : > { %p46_p1 = scmp.eq.s32.totalorder %s45_s26, 0  ;;  %p55_p2 = scmp.ne.s32.totalorder %s623_s14, %s619_s13 }
  0x2a   : > { %p56_p4 = scmp.eq.s32.totalorder %s627_s15, 0  ;;  %p459_p6 = scmp.lt.s32.totalorder %s627_s15, 4 }
  0x2b   : > { %s738_s17 = scalar_select %p46_p1, %s623_s14, %s48_s25  }
  0x2c   : > { %p57_p8 = por %p56_p4, %p55_p2  ;;  %p869_p11 = scmp.eq.s32.totalorder %s677_s16, 3 }
  0x2d   : > { %s148_s23 = sand.u32 1, %s623_s14   ;;  %s421_s27 = sshll.u32 %s627_s15, 8 }
  0x2e   : > { %p742_p12 = por %p869_p11, %p55_p2  ;;  %s407_s28 = sshll.u32 %s148_s23, 4 }
  0x2f   : > { %s751_s4 = scalar_lea.hbm %s859_s1, %s421_s27  ;;  %s152_s22 = scalar_lea.vmem [#allocation5], %s407_s28 }
  0x30   : > { %s159_s25 = sshll.u32 %s152_s22, 4  ;;  %p753_p10 = pnand %p459_p6, %p57_p8  ;;  %s757_s25 = int_to_ptr.vmem [resolvable:$true] %s159_s25 }
  0x31   : > { %s759_s5 = scalar_lea.sflag [#allocation6], %s148_s23  ;;  %s527_s6 = scalar_lea.hbm %s751_s4, 256 }
  0x32   : > { %p528_p13 = scmp.ne.s32.totalorder %s751_s4, %s527_s6  ;;  %p529_p0 = pneg %p753_p10 }
  0x33   : > { %s532_s11 = scalar_lea.hbm %s859_s1, 1024  ;;  %p533_p7 = scmp.lt.u32.totalorder %s751_s4, %s859_s1 }
  0x34   : > { %p530_p3 = pnand %p529_p0, %p528_p13  ;;  %p534_p9 = scmp.lt.u32.totalorder %s532_s11, %s527_s6 }
  0x35   : > { %p536_p2 = scmp.lt.u32.totalorder %s527_s6, %s751_s4 }
  0x36   : > { %p531_p5 = pneg %p530_p3  ;;  %p535_p1 = por %p534_p9, %p533_p7 }
  0x38   : > { %p537_p4 = por %p536_p2, %p535_p1 }
  0x3a   : > { %p538_p6 = pnand %p537_p4, %p531_p5 }
  0x3c   : > { %541 = shalt.err (!%p538_p6)
}
  0x3d   : > { %s542_s23 = scalar_lea.vmem %s757_s25, 256  ;;  %s632_s29 = smov [#allocation5]  }
  0x3e   : > { %p543_p8 = scmp.ne.s32.totalorder %s757_s25, %s542_s23  ;;  %s547_s30 = sshll.u32 %s632_s29, 4  ;;  %s548_s30 = int_to_ptr.vmem [resolvable:$false] %s547_s30 }
  0x3f   : > { %s549_s22 = scalar_lea.vmem %s548_s30, 512  ;;  %p550_p3 = scmp.lt.s32.totalorder %s757_s25, %s548_s30 }
  0x40   : > { %p545_p11 = pnand %p543_p8, %p529_p0  ;;  %p551_p7 = scmp.lt.s32.totalorder %s549_s22, %s542_s23 }
  0x42   : > { %p546_p13 = pneg %p545_p11  ;;  %p552_p9 = por %p551_p7, %p550_p3 }
  0x44   : > { %p553_p1 = pnand %p552_p9, %p546_p13 }
  0x46   : > { %556 = shalt.err (!%p553_p1)
}
  0x47   : > { %453 = dma.hbm_to_vmem [thread:$0]  (!%p753_p10), %s751_s4, 256, %s757_s25, %s759_s5, %s630_s8, %s630_s8, %s631_s9  }
  0x48   : > { %p872_p0 = scmp.ne.s32.totalorder %s867_s20, 0 }
  0x49   : > { %p873_p5 = scmp.eq.s32.totalorder (!%p872_p0), %s677_s16, 0 }
  0x4a   : > { %171 = sbr.rel (%p872_p0) target bundleno = 323 (0x143), region = 32 }
  0x51   : > { %602 = dma.done.wait (%p873_p5), [#allocation3], 256   ;;  %p874_p2 = pmov %p873_p5 }
  0x52   : > { %s797_s6 = sand.u32 1, %s619_s13   ;;  %p875_p4 = scmp.ne.s32.totalorder %s865_s18, 0 }
  0x53   : > { %604 = vsyncadd (%p874_p2), [#allocation3], 4294967040  ;;  %s412_s26 = sshll.u32 %s797_s6, 4  ;;  %s178_s7 = scalar_lea.sflag [#allocation6], %s797_s6 }
  0x54   : > { %s181_s10 = scalar_lea.vmem [#allocation5], %s412_s26 }
  0x55   : > { %606 = dma.done.wait (%p875_p4), %s178_s7, 256  }
  0x56   : > { %608 = vsyncadd (%p875_p4), %s178_s7, 4294967040  ;;  %vm219_vm0 = vcmask 130048   ;;  %v206_v0 = vld [vmem:[%s181_s10] sm:$0xff]  ;;  %v207_v1 = vld [vmem:[%s181_s10 + $0x8] sm:$0xff]  ;;  %p208_p10 = scmp.lt.s32.totalorder %s677_s16, 3  ;;  %v214_v5 = vlaneseq  ;;  %s203_s18 = scalar_lea.vmem [#allocation7], %s412_s26 }
  0x57   : > { %v204_v2 = vld [vmem:[#allocation2] sm:$0xff]  ;;  %v434_v3 = vpack.c.bf16 %v207_v1, %v206_v0  ;;  %v205_v4 = vld [vmem:[#allocation2 + $0x8] sm:$0xff]  ;;  %s318_s4 = sshll.u32 %s203_s18, 4  ;;  %s422_s25 = sshll.u32 %s677_s16, 8  ;;  %vm301_vm1 = vcmask 261120   ;;  %s810_s4 = int_to_ptr.vmem [resolvable:$true] %s318_s4 }
  0x58   : > { %431 = vmatprep.mubr.msk.f32.mxu0 %vm219_vm0, %v204_v2  ;;  %s209_s20 = scalar_select %p208_p10, 1.0, 0.0  ;;  %v215_v6 = vshrl.u32 %v214_v5, 7  ;;  %v210_v7 = vld [vmem:[%s860_s2] sm:$0x1] }
  0x59   : > { %435 = vmatprep.subr.bf16.mxu0 %v434_v3  ;;  %s815_s27 = scalar_lea.hbm %s861_s3, %s422_s25  ;;  %s305_s28 = scalar_lea.sflag [#allocation4], %s797_s6 }
  0x5a   : > { %437 = vmatpush3.bf16.msra.mxu0 %v434_v3  ;;  %v211_v8 = vstv %s209_s20  ;;  %v216_v10 = vsub.s32 0, %v215_v6  ;;  %s557_s23 = scalar_lea.vmem %s810_s4, 256  ;;  %s633_s16 = smov [#allocation7]  }
  0x5b   : > { %v212_v9 = vmul.f32 %v211_v8, %v210_v7  ;;  %p558_p6 = scmp.ne.s32.totalorder %s810_s4, %s557_s23  ;;  %s561_s29 = sshll.u32 %s633_s16, 4  ;;  %s562_s29 = int_to_ptr.vmem [resolvable:$false] %s561_s29 }
  0x5c   : > { %s563_s30 = scalar_lea.vmem %s562_s29, 512  ;;  %p564_p13 = scmp.lt.s32.totalorder %s810_s4, %s562_s29 }
  0x5d   : > { %432 = vmatmul.mubr.msk.f32.vlgmr.msra.gmra.mrb[0].mxu0 %vm219_vm0, %v205_v4  ;;  %v217_v11 = vrot.slane %v212_v9, %v216_v10  ;;  %p559_p8 = pnand %p558_p6, %p742_p12  ;;  %p565_p3 = scmp.lt.s32.totalorder %s563_s30, %s557_s23 }
  0x5f   : > { %p560_p11 = pneg %p559_p8  ;;  %p566_p7 = por %p565_p3, %p564_p13 }
  0x61   : > { %p567_p9 = pnand %p566_p7, %p560_p11 }
 0x130   : > { %v433_v12 = vpop.f32.mrb[0].mxu0 }
 0x131   : > { %v298_v13 = vadd.f32 %v433_v12, %v217_v11  ;;  %v292_v14 = vpop.f32.mrb[1].mxu0 }
 0x132   : > { %v293_v15 = vadd.f32 %v292_v14, %v217_v11 }
 0x133   : > { %303 = vst.msk [vmem:[%s203_s18 + $0x8] sm:$0xff] %vm301_vm1, %v298_v13 }
 0x134   : > { %302 = vst.msk [vmem:[%s203_s18] sm:$0xff] %vm301_vm1, %v293_v15 }
 0x135   : > { %570 = shalt.err (!%p567_p9)
}
 0x136   : > { %s571_s22 = scalar_lea.hbm %s815_s27, 256  ;;  %s575_s10 = scalar_lea.hbm %s861_s3, 1024 }
 0x137   : > { %p572_p1 = scmp.ne.s32.totalorder %s815_s27, %s571_s22  ;;  %p576_p2 = scmp.lt.u32.totalorder %s815_s27, %s861_s3 }
 0x138   : > { %p577_p4 = scmp.lt.u32.totalorder %s575_s10, %s571_s22  ;;  %p579_p6 = scmp.lt.u32.totalorder %s571_s22, %s815_s27 }
 0x139   : > { %p573_p0 = pnand %p572_p1, %p742_p12 }
 0x13a   : > { %p578_p10 = por %p577_p4, %p576_p2 }
 0x13b   : > { %p574_p5 = pneg %p573_p0 }
 0x13c   : > { %p580_p8 = por %p579_p6, %p578_p10 }
 0x13e   : > { %p581_p11 = pnand %p580_p8, %p574_p5 }
 0x140   : > { %584 = shalt.err (!%p581_p11)
}
 0x141   : > { %s634_s9 = smov 128   ;;  %s635_s18 = smov 8  }
 0x142   : > { %444 = dma.vmem_to_hbm [thread:$0]  (%p742_p12), %s810_s4, 256, %s815_s27, %s305_s28, %s634_s9, %s634_s9, %s635_s18  }
 0x143 PF: > { %p461_p13 = scmp.ge.s32.totalorder %s627_s15, 2  ;;  %s333_s25 = sand.u32 1, %s615_s12  }
 0x144   : > { %p876_p3 = scmp.ne.s32.totalorder %s866_s19, 0  ;;  %s334_s5 = scalar_lea.sflag [#allocation4], %s333_s25 }
 0x146   : > { %p455_p7 = pnand %p461_p13, %p876_p3 }
 0x148   : > { %610 = dma.done.wait (!%p455_p7), %s334_s5, 256  }
 0x149   : > { %612 = vsyncadd (!%p455_p7), %s334_s5, 4294967040  ;;  %p17_p9 = scmp.ge.s32.totalorder %s709_s24, 6   ;;  %s877_s12 = smov %s619_s13 }
 0x14a   : > { %s878_s13 = smov %s623_s14  ;;  %s879_s14 = smov %s738_s17 }
 0x14b   : > { %s880_s15 = smov %s709_s24  ;;  %19 = sbr.rel (!%p17_p9) target bundleno = 6 (0x6), region = 82 }
 0x152   :  { %339 = vsyncpa [#allocation3], 1 }
 0x153   :  { %341 = vsyncpa [#allocation3 + $0x1], 1 }
 0x154   :  { %342 = vsyncpa [#allocation6], 1 }
 0x155   :  { %344 = vsyncpa [#allocation6 + $0x1], 1 }
 0x156   :  { %345 = vsyncpa [#allocation4], 1 }
 0x157   :  { %347 = vsyncpa [#allocation4 + $0x1], 1 }

</bundles_post_ra>
